<compile_context>
chip_gen: v7x
topology: tpu7x:2x2x1
jax: 0.10.0
libtpu: 0.0.40
codegen_flags: <defaults>
</compile_context>

<pallas_src>
import functools

import jax
import jax.numpy as jnp
from jax.experimental import pallas as pl
from jax.experimental.pallas import tpu as pltpu

_MIB = 1024 * 1024


def _round_up(x, m):
    return (x + m - 1) // m * m


def _tpu_topology():
    """Returns (physical VMEM bytes, TensorCores per chip), conservative fallbacks."""
    vmem_cap = 64 * _MIB          # v7x-safe default if the query fails
    num_tc = 1
    try:
        vmem_cap = int(pltpu.get_tpu_info().vmem_capacity_bytes)
    except Exception:
        pass
    try:
        kind = jax.devices()[0].device_kind.lower()
        if "v7" in kind:          # v7x: 2 TensorCores per chip
            num_tc = 2
    except Exception:
        pass
    # Clamp so an odd query result cannot blow the budget.
    vmem_cap = min(max(vmem_cap, 64 * _MIB), 128 * _MIB)
    return vmem_cap, num_tc


def _kld_kernel(out_ref, tgt_ref, loss_ref, acc_ref, *,
                inv_tau, softmax_target, direct_target):
    """Processes one (block_rows, C) tile; accumulates the tile's KL into acc_ref."""
    i = pl.program_id(1)  # row-block (reduction) axis within this chunk

    @pl.when(i == 0)
    def _init():
        acc_ref[...] = jnp.zeros_like(acc_ref)

    # Student side: stable shifted logits + one full-tile exp.
    x = out_ref[...].astype(jnp.float32) * inv_tau
    x_sh = x - jnp.max(x, axis=-1, keepdims=True)
    ex = jnp.exp(x_sh)                                        # EUP pass (student)
    log_sum_ex = jnp.log(jnp.sum(ex, axis=-1, keepdims=True))  # (bR, 1)

    t = tgt_ref[...].astype(jnp.float32)
    if direct_target:
        # softmax_target and tau == 1: q is proportional to (targets + eps)
        # directly, so the teacher-side exp / max / sum passes are skipped.
        #   KL_row = (1/sum_q) * sum_j q_raw_j*(log(q_raw_j) - x_sh_j)
        #            + log(sum_ex) - log(sum_q)
        q_raw = t + 1e-10
        log_q_raw = jnp.log(q_raw)                            # EUP pass (teacher)
        sum_q = jnp.sum(q_raw, axis=-1, keepdims=True)        # (bR, 1)
        s = jnp.sum(q_raw * (log_q_raw - x_sh), axis=-1, keepdims=True)
        row_kl = s / sum_q + log_sum_ex - jnp.log(sum_q)      # (bR, 1)
    else:
        if softmax_target:
            t = jnp.log(t + 1e-10)                            # targets already softmaxed
        t = t * inv_tau                                       # teacher logits / T
        t_sh = t - jnp.max(t, axis=-1, keepdims=True)
        et = jnp.exp(t_sh)                                    # EUP pass (teacher)
        sum_et = jnp.sum(et, axis=-1, keepdims=True)          # (bR, 1)
        # Fused KL per row (uses sum_j q_j == 1 exactly):
        #   KL_row = (1/sum_et)*sum_j et_j*(t_sh_j - x_sh_j) + log(sum_ex) - log(sum_et)
        s = jnp.sum(et * (t_sh - x_sh), axis=-1, keepdims=True)
        row_kl = s / sum_et + log_sum_ex - jnp.log(sum_et)    # (bR, 1)

    # Scalar accumulator: one sublane reduce per step (free XLU slot).
    acc_ref[...] += jnp.sum(row_kl, axis=0, keepdims=True)

    @pl.when(i == pl.num_programs(1) - 1)
    def _finalize():
        loss_ref[...] = jnp.broadcast_to(acc_ref[...].reshape(1, 1, 1),
                                         loss_ref.shape)


def kl_div_loss_with_temperature(outputs, targets, *, tau=1.0,
                                 softmax_target=False, block_rows=None):
    """Pallas TPU implementation of KLDivLossWithTemperature.forward.

    outputs, targets: (N, C) float arrays (logits; probabilities for `targets`
    if softmax_target=True).  bf16 inputs are accepted as-is (math is done in
    f32 in-kernel) and are preferred on this HBM-bound kernel.
    Returns a scalar float32 loss.
    """
    N, C = outputs.shape
    o_itemsize = jnp.dtype(outputs.dtype).itemsize
    t_itemsize = jnp.dtype(targets.dtype).itemsize

    vmem_cap, num_tc = _tpu_topology()

    # Tile sizing: keep 2 inputs x 2 pipeline buffers under ~3/8 of physical
    # VMEM (48 MiB on 128-MiB v5e/v6e, 24 MiB on 64-MiB v7x).  No row cap --
    # byte budget only -- so DMAs stay multi-MiB regardless of C.
    tile_budget_bytes = (3 * vmem_cap) // 8
    per_row_bytes = 2 * C * (o_itemsize + t_itemsize)   # both inputs, double-buffered
    budget_rows = max(8, (tile_budget_bytes // per_row_bytes) // 8 * 8)
    if block_rows is None:
        block_rows = min(budget_rows, _round_up(N, 8))
    block_rows = max(8, min(_round_up(block_rows, 8), budget_rows))

    steps_total = pl.cdiv(N, block_rows)
    # Only split into 2 chunks when the chip actually has 2 TensorCores (v7x);
    # on single-TC chips the chunk axis would just add padded HBM traffic.
    num_chunks = num_tc if steps_total >= num_tc else 1
    steps_per_chunk = pl.cdiv(steps_total, num_chunks)
    total_blocks = num_chunks * steps_per_chunk
    # Rebalance block_rows so padding is < 8 rows per block (instead of up to a
    # whole extra block when steps_total is odd on a 2-chunk split).
    block_rows = max(8, _round_up(pl.cdiv(N, total_blocks), 8))
    padded_N = total_blocks * block_rows

    if padded_N != N:
        pad = padded_N - N
        # Zero-padded rows give uniform softmaxes on both sides -> KL == 0
        # (also exactly 0 on the softmax_target / direct-q paths).
        outputs = jnp.pad(outputs, ((0, pad), (0, 0)))
        targets = jnp.pad(targets, ((0, pad), (0, 0)))

    inv_tau = float(1.0 / tau)
    scale = float(tau * tau) / float(N * C)            # unpadded element count
    direct_target = bool(softmax_target) and float(tau) == 1.0

    kernel = functools.partial(_kld_kernel, inv_tau=inv_tau,
                               softmax_target=softmax_target,
                               direct_target=direct_target)

    # Scoped VMEM: ~3/4 of physical (96 MiB on v5e/v6e, 48 MiB on v7x); raised
    # further if a minimal 8-row tile at huge C would not fit, capped below
    # physical.  TODO(synk): replace with a C-axis online-softmax split.
    tile_bytes = block_rows * C * (o_itemsize + t_itemsize)   # one buffer pair
    vmem_limit = max((3 * vmem_cap) // 4, 2 * tile_bytes + 2 * _MIB)
    vmem_limit = int(min(vmem_limit, vmem_cap - 4 * _MIB))

    if direct_target:
        transcendentals = 2 * padded_N * C     # 1 exp (student) + 1 log (teacher)
    elif softmax_target:
        transcendentals = 3 * padded_N * C     # 2 exp + 1 log
    else:
        transcendentals = 2 * padded_N * C     # 2 exp
    cost = pl.CostEstimate(
        flops=10 * padded_N * C,
        transcendentals=transcendentals,
        bytes_accessed=padded_N * C * (o_itemsize + t_itemsize)
        + num_chunks * 8 * 128 * 4,
    )

    # TODO(synk): on v7x, verify via xprof that the leading "parallel" axis
    # actually shards across both TensorCores; if not, switch to CORE_PARALLEL
    # or pl.core_map.
    partials = pl.pallas_call(
        kernel,
        out_shape=jax.ShapeDtypeStruct((num_chunks, 8, 128), jnp.float32),
        grid_spec=pltpu.PrefetchScalarGridSpec(
            num_scalar_prefetch=0,
            grid=(num_chunks, steps_per_chunk),
            in_specs=[
                pl.BlockSpec((block_rows, C),
                             lambda c, i: (c * steps_per_chunk + i, 0)),
                pl.BlockSpec((block_rows, C),
                             lambda c, i: (c * steps_per_chunk + i, 0)),
            ],
            out_specs=pl.BlockSpec((1, 8, 128), lambda c, i: (c, 0, 0)),
            scratch_shapes=[pltpu.VMEM((1, 1), jnp.float32)],
        ),
        compiler_params=pltpu.CompilerParams(
            dimension_semantics=("parallel", "arbitrary"),
            vmem_limit_bytes=vmem_limit,
        ),
        cost_estimate=cost,
    )(outputs, targets)

    # Every element of a chunk's (8,128) slab holds that chunk's partial sum.
    return jnp.sum(partials[:, 0, 0]) * scale


def _reference(outputs, targets, tau=1.0, softmax_target=False):
    """Pure-JAX reference mirroring the PyTorch forward."""
    T = tau
    t = targets
    if softmax_target:
        t = jnp.log(t + 1e-10)
    log_p = jax.nn.log_softmax(outputs / T, axis=1)
    log_q = jax.nn.log_softmax(t / T, axis=1)
    kl = jnp.sum(jnp.exp(log_q) * (log_q - log_p))
    return kl * (T * T) / outputs.size


if __name__ == "__main__":
    key = jax.random.PRNGKey(0)
    k1, k2, k3, k4, k5 = jax.random.split(key, 5)

    # Case 1: logits targets, tau=2, auto tile size (single chunk / single step).
    N, C = 64, 32
    outputs = jax.random.normal(k1, (N, C), dtype=jnp.float32)
    targets = jax.random.normal(k2, (N, C), dtype=jnp.float32)
    loss1 = jax.block_until_ready(
        kl_div_loss_with_temperature(outputs, targets, tau=2.0))
    ref1 = _reference(outputs, targets, tau=2.0)
    assert jnp.allclose(loss1, ref1, rtol=1e-4, atol=1e-6), (loss1, ref1)

    # Case 2: softmaxed targets, tau!=1, ragged batch + forced tiny block_rows
    # (exercises zero-row padding, multi-step reduction, chunk rebalancing).
    N2, C2 = 50, 32
    out2 = jax.random.normal(k1, (N2, C2), dtype=jnp.float32)
    tgt2 = jax.nn.softmax(jax.random.normal(k3, (N2, C2), dtype=jnp.float32),
                          axis=1)
    loss2 = jax.block_until_ready(
        kl_div_loss_with_temperature(out2, tgt2, tau=1.5,
                                     softmax_target=True, block_rows=8))
    ref2 = _reference(out2, tgt2, tau=1.5, softmax_target=True)
    assert jnp.allclose(loss2, ref2, rtol=1e-4, atol=1e-6), (loss2, ref2)

    # Case 3: softmaxed targets with tau=1 (direct-q fast path, one fewer exp).
    N3, C3 = 40, 128
    out3 = jax.random.normal(k4, (N3, C3), dtype=jnp.float32)
    tgt3 = jax.nn.softmax(jax.random.normal(k5, (N3, C3), dtype=jnp.float32),
                          axis=1)
    loss3 = jax.block_until_ready(
        kl_div_loss_with_temperature(out3, tgt3, tau=1.0, softmax_target=True))
    ref3 = _reference(out3, tgt3, tau=1.0, softmax_target=True)
    assert jnp.allclose(loss3, ref3, rtol=1e-4, atol=1e-6), (loss3, ref3)

    # Case 4: bf16 logits in (half the HBM traffic), f32 math in-kernel.
    out4 = outputs.astype(jnp.bfloat16)
    tgt4 = targets.astype(jnp.bfloat16)
    loss4 = jax.block_until_ready(
        kl_div_loss_with_temperature(out4, tgt4, tau=2.0))
    ref4 = _reference(out4.astype(jnp.float32), tgt4.astype(jnp.float32), tau=2.0)
    assert jnp.allclose(loss4, ref4, rtol=1e-3, atol=1e-5), (loss4, ref4)

    print("KERNEL_OK")
</pallas_src>

<mosaic_0001>
module attributes {stable_mosaic.version = 11 : i64} {
  func.func @_kld_kernel(%arg0: i32, %arg1: i32, %arg2: memref<64x32xf32, #tpu.memory_space<vmem>>, %arg3: memref<64x32xf32, #tpu.memory_space<vmem>>, %arg4: memref<1x8x128xf32, #tpu.memory_space<vmem>>, %arg5: memref<1x1xf32, #tpu.memory_space<vmem>>) attributes {dimension_semantics = [#tpu.dimension_semantics<parallel>, #tpu.dimension_semantics<arbitrary>], iteration_bounds = array<i64: 1, 1>, scalar_prefetch = 0 : i64, scratch_operands = 1 : i64, tpu.core_type = #tpu.core_type<tc>, window_params = [{transform_indices = @transform_0, window_bounds = array<i64: 64, 32>}, {transform_indices = @transform_1, window_bounds = array<i64: 64, 32>}, {transform_indices = @transform_2, window_bounds = array<i64: 1, 8, 128>}]} {
    %c0_i32 = arith.constant 0 : i32
    %0 = arith.cmpi eq, %arg1, %c0_i32 : i32
    %1 = arith.extui %0 : i1 to i32
    %c0_i32_0 = arith.constant 0 : i32
    %2 = arith.cmpi ne, %1, %c0_i32_0 : i32
    scf.if %2 {
      %cst_17 = arith.constant 0.000000e+00 : f32
      %40 = vector.broadcast %cst_17 : f32 to vector<1x1xf32>
      %c0_18 = arith.constant 0 : index
      %c0_19 = arith.constant 0 : index
      %41 = vector.load %arg5[%c0_18, %c0_19] : memref<1x1xf32, #tpu.memory_space<vmem>>, vector<1x1xf32>
      tpu.vector_store %arg5[%c0_18, %c0_19], %40 {strides = array<i32>} : memref<1x1xf32, #tpu.memory_space<vmem>>, vector<1x1xf32>,
    } else {
    }
    %c0 = arith.constant 0 : index
    %c0_1 = arith.constant 0 : index
    %3 = vector.load %arg2[%c0, %c0_1] : memref<64x32xf32, #tpu.memory_space<vmem>>, vector<64x32xf32>
    %cst = arith.constant 5.000000e-01 : f32
    %4 = vector.broadcast %cst : f32 to vector<64x32xf32>
    %5 = arith.mulf %3, %4 : vector<64x32xf32>
    %cst_2 = arith.constant dense<0xFF800000> : vector<64xf32>
    %6 = vector.multi_reduction <maximumf>, %5, %cst_2 [1] : vector<64x32xf32> to vector<64xf32>
    %7 = vector.shape_cast %6 : vector<64xf32> to vector<64x1xf32>
    %8 = vector.broadcast %7 : vector<64x1xf32> to vector<64x32xf32>
    %9 = arith.subf %5, %8 : vector<64x32xf32>
    %10 = math.exp %9 : vector<64x32xf32>
    %cst_3 = arith.constant dense<0.000000e+00> : vector<64xf32>
    %11 = vector.multi_reduction <add>, %10, %cst_3 [1] : vector<64x32xf32> to vector<64xf32>
    %12 = vector.shape_cast %11 : vector<64xf32> to vector<64x1xf32>
    %13 = math.log %12 : vector<64x1xf32>
    %c0_4 = arith.constant 0 : index
    %c0_5 = arith.constant 0 : index
    %14 = vector.load %arg3[%c0_4, %c0_5] : memref<64x32xf32, #tpu.memory_space<vmem>>, vector<64x32xf32>
    %cst_6 = arith.constant 5.000000e-01 : f32
    %15 = vector.broadcast %cst_6 : f32 to vector<64x32xf32>
    %16 = arith.mulf %14, %15 : vector<64x32xf32>
    %cst_7 = arith.constant dense<0xFF800000> : vector<64xf32>
    %17 = vector.multi_reduction <maximumf>, %16, %cst_7 [1] : vector<64x32xf32> to vector<64xf32>
    %18 = vector.shape_cast %17 : vector<64xf32> to vector<64x1xf32>
    %19 = vector.broadcast %18 : vector<64x1xf32> to vector<64x32xf32>
    %20 = arith.subf %16, %19 : vector<64x32xf32>
    %21 = math.exp %20 : vector<64x32xf32>
    %cst_8 = arith.constant dense<0.000000e+00> : vector<64xf32>
    %22 = vector.multi_reduction <add>, %21, %cst_8 [1] : vector<64x32xf32> to vector<64xf32>
    %23 = vector.shape_cast %22 : vector<64xf32> to vector<64x1xf32>
    %24 = arith.subf %20, %9 : vector<64x32xf32>
    %25 = arith.mulf %21, %24 : vector<64x32xf32>
    %cst_9 = arith.constant dense<0.000000e+00> : vector<64xf32>
    %26 = vector.multi_reduction <add>, %25, %cst_9 [1] : vector<64x32xf32> to vector<64xf32>
    %27 = vector.shape_cast %26 : vector<64xf32> to vector<64x1xf32>
    %28 = arith.divf %27, %23 : vector<64x1xf32>
    %29 = arith.addf %28, %13 : vector<64x1xf32>
    %30 = math.log %23 : vector<64x1xf32>
    %31 = arith.subf %29, %30 : vector<64x1xf32>
    %c0_10 = arith.constant 0 : index
    %c0_11 = arith.constant 0 : index
    %32 = vector.load %arg5[%c0_10, %c0_11] : memref<1x1xf32, #tpu.memory_space<vmem>>, vector<1x1xf32>
    %cst_12 = arith.constant dense<0.000000e+00> : vector<1xf32>
    %33 = vector.multi_reduction <add>, %31, %cst_12 [0] : vector<64x1xf32> to vector<1xf32>
    %34 = vector.shape_cast %33 : vector<1xf32> to vector<1x1xf32>
    %35 = arith.addf %32, %34 : vector<1x1xf32>
    %c0_13 = arith.constant 0 : index
    %c0_14 = arith.constant 0 : index
    %36 = vector.load %arg5[%c0_13, %c0_14] : memref<1x1xf32, #tpu.memory_space<vmem>>, vector<1x1xf32>
    tpu.vector_store %arg5[%c0_13, %c0_14], %35 {strides = array<i32>} : memref<1x1xf32, #tpu.memory_space<vmem>>, vector<1x1xf32>,
    %c0_i32_15 = arith.constant 0 : i32
    %37 = arith.cmpi eq, %arg1, %c0_i32_15 : i32
    %38 = arith.extui %37 : i1 to i32
    %c0_i32_16 = arith.constant 0 : i32
    %39 = arith.cmpi ne, %38, %c0_i32_16 : i32
    scf.if %39 {
      %c0_17 = arith.constant 0 : index
      %c0_18 = arith.constant 0 : index
      %40 = vector.load %arg5[%c0_17, %c0_18] : memref<1x1xf32, #tpu.memory_space<vmem>>, vector<1x1xf32>
      %41 = vector.shape_cast %40 : vector<1x1xf32> to vector<1x1x1xf32>
      %42 = vector.shape_cast %41 : vector<1x1x1xf32> to vector<1x1x1xf32>
      %43 = vector.broadcast %42 : vector<1x1x1xf32> to vector<1x8x128xf32>
      %c0_19 = arith.constant 0 : index
      %c0_20 = arith.constant 0 : index
      %c0_21 = arith.constant 0 : index
      %44 = vector.load %arg4[%c0_19, %c0_20, %c0_21] : memref<1x8x128xf32, #tpu.memory_space<vmem>>, vector<1x8x128xf32>
      tpu.vector_store %arg4[%c0_19, %c0_20, %c0_21], %43 {strides = array<i32>} : memref<1x8x128xf32, #tpu.memory_space<vmem>>, vector<1x8x128xf32>,
    } else {
    }
    return
  }
  func.func @transform_0(%arg0: i32, %arg1: i32) -> (i32, i32) {
    %c1_i32 = arith.constant 1 : i32
    %0 = arith.muli %arg0, %c1_i32 : i32
    %1 = arith.addi %0, %arg1 : i32
    %c0_i32 = arith.constant 0 : i32
    %c0_i32_0 = arith.constant 0 : i32
    return %1, %c0_i32 : i32, i32
  }
  func.func @transform_1(%arg0: i32, %arg1: i32) -> (i32, i32) {
    %c1_i32 = arith.constant 1 : i32
    %0 = arith.muli %arg0, %c1_i32 : i32
    %1 = arith.addi %0, %arg1 : i32
    %c0_i32 = arith.constant 0 : i32
    %c0_i32_0 = arith.constant 0 : i32
    return %1, %c0_i32 : i32, i32
  }
  func.func @transform_2(%arg0: i32, %arg1: i32) -> (i32, i32, i32) {
    %c0_i32 = arith.constant 0 : i32
    %c0_i32_0 = arith.constant 0 : i32
    %c0_i32_1 = arith.constant 0 : i32
    return %arg0, %c0_i32, %c0_i32_0 : i32, i32, i32
  }
}

</mosaic_0001>

<bundles_post_ra>
// kernel: tpu_custom_call.1
= control target key start
LH: loop header
LB: loop body
LE: loop exit
PB: predicated region body
PF: predicated region fallthrough
CT: control target
= control target key end

     0   :  { %vm78_vm0 = vcmask 261120   ;;  %s765_s0 = inlined_call_operand.vmem [shape: f32[64,32], index: 0, kind: input, shape index: {}]   ;;  %s766_s1 = inlined_call_operand.vmem [shape: f32[64,32], index: 1, kind: input, shape index: {}]   ;;  %s767_s2 = inlined_call_operand.hbm [shape: f32[1,8,128], index: 2, kind: output, shape index: {}]  }
   0x1   :  { %v167_v0 = vld [vmem:[%s766_s1] sm:$0xff]  ;;  %v168_v2 = vld [vmem:[%s766_s1 + $0x8] sm:$0xff]  ;;  %v169_v8 = vld [vmem:[%s766_s1 + $0x10] sm:$0xff] }
   0x2   :  { %v62_v1 = vld [vmem:[%s765_s0] sm:$0xff]  ;;  %v536_v3 = vmul.f32 0.5, %v167_v0  ;;  %v540_v5 = vmul.f32 0.5, %v168_v2  ;;  %v63_v6 = vld [vmem:[%s765_s0 + $0x8] sm:$0xff]  ;;  %v64_v9 = vld [vmem:[%s765_s0 + $0x10] sm:$0xff]  ;;  %v561_v14 = vmul.f32 0.5, %v169_v8 }
   0x3   :  { %v538_v4 = vmul.f32 0.5, %v62_v1  ;;  %v545_v7 = vmul.f32 0.5, %v63_v6  ;;  %v563_v15 = vmul.f32 0.5, %v64_v9  ;;  %v170_v16 = vld [vmem:[%s766_s1 + $0x18] sm:$0xff] }
   0x4   :  { %v183_v10 = vsel %vm78_vm0, %v536_v3, -inf  ;;  %v186_v12 = vsel %vm78_vm0, %v540_v5, -inf  ;;  %v65_v17 = vld [vmem:[%s765_s0 + $0x18] sm:$0xff] }
   0x5   :  { %v79_v11 = vsel %vm78_vm0, %v538_v4, -inf  ;;  %184 = vmax.xlane.f32.xlu1 %v183_v10  ;;  %v82_v13 = vsel %vm78_vm0, %v545_v7, -inf }
   0x6   :  { %80 = vmax.xlane.f32.xlu0 %v79_v11 }
   0x7   :  { %7 = vsyncpa [#allocation4], 0  ;;  %v189_v18 = vsel %vm78_vm0, %v561_v14, -inf  ;;  %v85_v19 = vsel %vm78_vm0, %v563_v15, -inf  ;;  %v575_v20 = vmul.f32 0.5, %v170_v16  ;;  %v577_v21 = vmul.f32 0.5, %v65_v17 }
   0x8   :  { %v171_v22 = vld [vmem:[%s766_s1 + $0x20] sm:$0xff]  ;;  %v172_v28 = vld [vmem:[%s766_s1 + $0x28] sm:$0xff]  ;;  %v173_v34 = vld [vmem:[%s766_s1 + $0x30] sm:$0xff]  ;;  %vm60_vm1 = vcmask 0  }
   0x9   :  { %187 = vmax.xlane.f32.xlu1 %v186_v12  ;;  %v66_v23 = vld [vmem:[%s765_s0 + $0x20] sm:$0xff]  ;;  %v192_v24 = vsel %vm78_vm0, %v575_v20, -inf  ;;  %v88_v25 = vsel %vm78_vm0, %v577_v21, -inf  ;;  %v589_v26 = vmul.f32 0.5, %v171_v22  ;;  %v67_v29 = vld [vmem:[%s765_s0 + $0x28] sm:$0xff]  ;;  %v603_v32 = vmul.f32 0.5, %v172_v28 }
   0xa   :  { %83 = vmax.xlane.f32.xlu0 %v82_v13  ;;  %v591_v27 = vmul.f32 0.5, %v66_v23  ;;  %v605_v33 = vmul.f32 0.5, %v67_v29  ;;  %v68_v35 = vld [vmem:[%s765_s0 + $0x30] sm:$0xff]  ;;  %v617_v38 = vmul.f32 0.5, %v173_v34  ;;  %v174_v40 = vld [vmem:[%s766_s1 + $0x38] sm:$0xff] }
   0xb   :  { %v195_v30 = vsel %vm78_vm0, %v589_v26, -inf  ;;  %v198_v36 = vsel %vm78_vm0, %v603_v32, -inf  ;;  %v619_v39 = vmul.f32 0.5, %v68_v35  ;;  %v69_v41 = vld [vmem:[%s765_s0 + $0x38] sm:$0xff]  ;;  %v631_v44 = vmul.f32 0.5, %v174_v40  ;;  %s511_s0 = smov [#allocation3]  }
   0xc   :  { %v91_v31 = vsel %vm78_vm0, %v591_v27, -inf  ;;  %v94_v37 = vsel %vm78_vm0, %v605_v33, -inf  ;;  %v201_v42 = vsel %vm78_vm0, %v617_v38, -inf  ;;  %v633_v45 = vmul.f32 0.5, %v69_v41  ;;  %s380_s1 = sshll.u32 %s511_s0, 4  ;;  %s381_s1 = int_to_ptr.vmem [resolvable:$true] %s380_s1 }
   0xd   :  { %190 = vmax.xlane.f32.xlu1 %v189_v18  ;;  %v97_v43 = vsel %vm78_vm0, %v619_v39, -inf  ;;  %v204_v46 = vsel %vm78_vm0, %v631_v44, -inf  ;;  %s485_s13 = scalar_lea.vmem %s381_s1, 128  ;;  %p490_p1 = scmp.lt.s32.totalorder %s381_s1, %s381_s1 }
   0xe   :  { %86 = vmax.xlane.f32.xlu0 %v85_v19  ;;  %v100_v47 = vsel %vm78_vm0, %v633_v45, -inf  ;;  %p486_p0 = scmp.ne.s32.totalorder %s381_s1, %s485_s13  ;;  %p491_p2 = scmp.lt.s32.totalorder %s485_s13, %s485_s13 }
  0x10   :  { %p492_p3 = por %p491_p2, %p490_p1 }
  0x11   :  { %193 = vmax.xlane.f32.xlu1 %v192_v24 }
  0x12   :  { %89 = vmax.xlane.f32.xlu0 %v88_v25  ;;  %p493_p4 = pnand %p492_p3, %p486_p0 }
  0x15   :  { %196 = vmax.xlane.f32.xlu1 %v195_v30 }
  0x16   :  { %92 = vmax.xlane.f32.xlu0 %v91_v31 }
  0x19   :  { %199 = vmax.xlane.f32.xlu1 %v198_v36 }
  0x1a   :  { %95 = vmax.xlane.f32.xlu0 %v94_v37 }
  0x1d   :  { %202 = vmax.xlane.f32.xlu1 %v201_v42 }
  0x1e   :  { %98 = vmax.xlane.f32.xlu0 %v97_v43 }
  0x21   :  { %205 = vmax.xlane.f32.xlu1 %v204_v46 }
  0x22   :  { %101 = vmax.xlane.f32.xlu0 %v100_v47 }
  0x92   :  { %v185_v48 = vpop.xlane.xlu1 %184 }
  0x93   :  { %v81_v49 = vpop.xlane.xlu0 %80  ;;  %v640_v50 = vsub.f32 %v536_v3, %v185_v48 }
  0x94   :  { %v643_v51 = vsub.f32 %v538_v4, %v81_v49 }
  0x95   :  { %v215_v53 = vmul.f32 1.442695, %v640_v50 }
  0x96   :  { %v111_v52 = vmul.f32 1.442695, %v643_v51  ;;  %v188_v54 = vpop.xlane.xlu1 %187 }
  0x97   :  { %v84_v55 = vpop.xlane.xlu0 %83  ;;  %v648_v56 = vsub.f32 %v540_v5, %v188_v54 }
  0x98   :  { %v651_v57 = vsub.f32 %v545_v7, %v84_v55  ;;  %405 = vpow2.f32 %v111_v52 }
  0x99   :  { %407 = vpow2.f32 %v215_v53  ;;  %v217_v59 = vmul.f32 1.442695, %v648_v56 }
  0x9a   :  { %v113_v58 = vmul.f32 1.442695, %v651_v57  ;;  %v191_v60 = vpop.xlane.xlu1 %190 }
  0x9b   :  { %v87_v61 = vpop.xlane.xlu0 %86  ;;  %v656_v62 = vsub.f32 %v561_v14, %v191_v60 }
  0x9c   :  { %v659_v63 = vsub.f32 %v563_v15, %v87_v61  ;;  %409 = vpow2.f32 %v113_v58 }
  0x9d   :  { %411 = vpow2.f32 %v217_v59  ;;  %v219_v1 = vmul.f32 1.442695, %v656_v62 }
  0x9e   :  { %v115_v0 = vmul.f32 1.442695, %v659_v63  ;;  %v194_v2 = vpop.xlane.xlu1 %193 }
  0x9f   :  { %v90_v3 = vpop.xlane.xlu0 %89  ;;  %v664_v4 = vsub.f32 %v575_v20, %v194_v2 }
  0xa0   :  { %v667_v5 = vsub.f32 %v577_v21, %v90_v3  ;;  %413 = vpow2.f32 %v115_v0 }
  0xa1   :  { %415 = vpow2.f32 %v219_v1  ;;  %v221_v8 = vmul.f32 1.442695, %v664_v4  ;;  %v255_v1 = vsub.f32 %v640_v50, %v643_v51 }
  0xa2   :  { %v117_v6 = vmul.f32 1.442695, %v667_v5  ;;  %v406_v7 = vpop.eup %405  ;;  %v197_v9 = vpop.xlane.xlu1 %196 }
  0xa3   :  { %v93_v10 = vpop.xlane.xlu0 %92  ;;  %v672_v11 = vsub.f32 %v589_v26, %v197_v9  ;;  %v127_v13 = vsel %vm78_vm0, %v406_v7, 0.0  ;;  %v678_v14 = vpop.eup %407  ;;  %v256_v9 = vsub.f32 %v648_v56, %v651_v57 }
  0xa4   :  { %v675_v12 = vsub.f32 %v591_v27, %v93_v10  ;;  %417 = vpow2.f32 %v117_v6  ;;  %128 = vadd.xlane.f32.xlu0 %v127_v13  ;;  %v231_v16 = vsel %vm78_vm0, %v678_v14, 0.0  ;;  %v263_v7 = vmul.f32 %v678_v14, %v255_v1 }
  0xa5   :  { %419 = vpow2.f32 %v221_v8  ;;  %v223_v18 = vmul.f32 1.442695, %v672_v11  ;;  %v257_v10 = vsub.f32 %v656_v62, %v659_v63  ;;  %v258_v14 = vsub.f32 %v664_v4, %v667_v5 }
  0xa6   :  { %v119_v15 = vmul.f32 1.442695, %v675_v12  ;;  %v410_v17 = vpop.eup %409  ;;  %v200_v19 = vpop.xlane.xlu1 %199  ;;  %v271_v50 = vsel %vm78_vm0, %v263_v7, 0.0 }
  0xa7   :  { %v96_v20 = vpop.xlane.xlu0 %95  ;;  %v685_v21 = vsub.f32 %v603_v32, %v200_v19  ;;  %v130_v23 = vsel %vm78_vm0, %v410_v17, 0.0  ;;  %v691_v24 = vpop.eup %411 }
  0xa8   :  { %v688_v22 = vsub.f32 %v605_v33, %v96_v20  ;;  %421 = vpow2.f32 %v119_v15  ;;  %232 = vadd.xlane.f32.xlu0 %v231_v16  ;;  %131 = vadd.xlane.f32.xlu1 %v130_v23  ;;  %v234_v26 = vsel %vm78_vm0, %v691_v24, 0.0  ;;  %v264_v51 = vmul.f32 %v691_v24, %v256_v9 }
  0xa9   :  { %423 = vpow2.f32 %v223_v18  ;;  %v225_v28 = vmul.f32 1.442695, %v685_v21  ;;  %v259_v16 = vsub.f32 %v672_v11, %v675_v12 }
  0xaa   :  { %v121_v25 = vmul.f32 1.442695, %v688_v22  ;;  %v414_v27 = vpop.eup %413  ;;  %v203_v29 = vpop.xlane.xlu1 %202  ;;  %v274_v56 = vsel %vm78_vm0, %v264_v51, 0.0  ;;  %v260_v17 = vsub.f32 %v685_v21, %v688_v22  ;;  %v509_v22 = vmov 0.0  }
  0xab   :  { %v99_v30 = vpop.xlane.xlu0 %98  ;;  %v698_v31 = vsub.f32 %v617_v38, %v203_v29  ;;  %v133_v33 = vsel %vm78_vm0, %v414_v27, 0.0  ;;  %v416_v34 = vpop.eup %415  ;;  %61 = vst.msk [vmem:[#allocation2] sm:$0x1] %vm60_vm1, %v509_v22 }
  0xac   :  { %v701_v32 = vsub.f32 %v619_v39, %v99_v30  ;;  %425 = vpow2.f32 %v121_v25  ;;  %235 = vadd.xlane.f32.xlu1 %v234_v26  ;;  %134 = vadd.xlane.f32.xlu0 %v133_v33  ;;  %v237_v36 = vsel %vm78_vm0, %v416_v34, 0.0  ;;  %v265_v15 = vmul.f32 %v416_v34, %v257_v10 }
  0xad   :  { %427 = vpow2.f32 %v225_v28  ;;  %v227_v40 = vmul.f32 1.442695, %v698_v31  ;;  %v510_v25 = vmov 0  }
  0xae   :  { %v123_v35 = vmul.f32 1.442695, %v701_v32  ;;  %v418_v37 = vpop.eup %417  ;;  %v206_v41 = vpop.xlane.xlu1 %205  ;;  %v277_v57 = vsel %vm78_vm0, %v265_v15, 0.0  ;;  %v261_v18 = vsub.f32 %v698_v31, %v701_v32  ;;  %404 = vset.pattern.permute.xlu0 %v510_v25 }
  0xaf   :  { %v102_v38 = vpop.xlane.xlu0 %101  ;;  %v708_v42 = vsub.f32 %v631_v44, %v206_v41  ;;  %v136_v43 = vsel %vm78_vm0, %v418_v37, 0.0  ;;  %v420_v46 = vpop.eup %419 }
  0xb0   :  { %v711_v39 = vsub.f32 %v633_v45, %v102_v38  ;;  %429 = vpow2.f32 %v123_v35  ;;  %238 = vadd.xlane.f32.xlu1 %v237_v36  ;;  %137 = vadd.xlane.f32.xlu0 %v136_v43  ;;  %v240_v48 = vsel %vm78_vm0, %v420_v46, 0.0  ;;  %v266_v62 = vmul.f32 %v420_v46, %v258_v14 }
  0xb1   :  { %431 = vpow2.f32 %v227_v40  ;;  %v229_v52 = vmul.f32 1.442695, %v708_v42 }
  0xb2   :  { %v125_v47 = vmul.f32 1.442695, %v711_v39  ;;  %v422_v49 = vpop.eup %421  ;;  %v280_v19 = vsel %vm78_vm0, %v266_v62, 0.0  ;;  %v262_v12 = vsub.f32 %v708_v42, %v711_v39 }
  0xb3   :  { %v139_v44 = vsel %vm78_vm0, %v422_v49, 0.0  ;;  %v424_v53 = vpop.eup %423 }
  0xb4   :  { %433 = vpow2.f32 %v125_v47  ;;  %241 = vadd.xlane.f32.xlu1 %v240_v48  ;;  %140 = vadd.xlane.f32.xlu0 %v139_v44  ;;  %v243_v45 = vsel %vm78_vm0, %v424_v53, 0.0  ;;  %v267_v63 = vmul.f32 %v424_v53, %v259_v16 }
  0xb5   :  { %435 = vpow2.f32 %v229_v52 }
  0xb6   :  { %v426_v54 = vpop.eup %425  ;;  %v283_v4 = vsel %vm78_vm0, %v267_v63, 0.0 }
  0xb7   :  { %v142_v55 = vsel %vm78_vm0, %v426_v54, 0.0  ;;  %v428_v58 = vpop.eup %427 }
  0xb8   :  { %244 = vadd.xlane.f32.xlu1 %v243_v45  ;;  %143 = vadd.xlane.f32.xlu0 %v142_v55  ;;  %v246_v59 = vsel %vm78_vm0, %v428_v58, 0.0  ;;  %v268_v5 = vmul.f32 %v428_v58, %v260_v17 }
  0xba   :  { %v430_v60 = vpop.eup %429  ;;  %v286_v20 = vsel %vm78_vm0, %v268_v5, 0.0 }
  0xbb   :  { %v145_v61 = vsel %vm78_vm0, %v430_v60, 0.0  ;;  %v432_v0 = vpop.eup %431 }
  0xbc   :  { %247 = vadd.xlane.f32.xlu1 %v246_v59  ;;  %146 = vadd.xlane.f32.xlu0 %v145_v61  ;;  %v249_v2 = vsel %vm78_vm0, %v432_v0, 0.0  ;;  %v269_v11 = vmul.f32 %v432_v0, %v261_v18 }
  0xbe   :  { %v434_v3 = vpop.eup %433  ;;  %v289_v23 = vsel %vm78_vm0, %v269_v11, 0.0 }
  0xbf   :  { %v148_v6 = vsel %vm78_vm0, %v434_v3, 0.0  ;;  %v436_v8 = vpop.eup %435 }
  0xc0   :  { %250 = vadd.xlane.f32.xlu1 %v249_v2  ;;  %149 = vadd.xlane.f32.xlu0 %v148_v6  ;;  %v252_v13 = vsel %vm78_vm0, %v436_v8, 0.0  ;;  %v270_v24 = vmul.f32 %v436_v8, %v262_v12 }
  0xc2   :  { %v292_v21 = vsel %vm78_vm0, %v270_v24, 0.0 }
  0xc4   :  { %253 = vadd.xlane.f32.xlu1 %v252_v13  ;;  %272 = vadd.xlane.f32.xlu0 %v271_v50 }
  0xc8   :  { %275 = vadd.xlane.f32.xlu1 %v274_v56  ;;  %278 = vadd.xlane.f32.xlu0 %v277_v57 }
  0xcc   :  { %281 = vadd.xlane.f32.xlu1 %v280_v19  ;;  %284 = vadd.xlane.f32.xlu0 %v283_v4 }
  0xd0   :  { %287 = vadd.xlane.f32.xlu1 %v286_v20  ;;  %290 = vadd.xlane.f32.xlu0 %v289_v23 }
  0xd4   :  { %293 = vadd.xlane.f32.xlu1 %v292_v21 }
 0x131   :  { %v129_v26 = vpop.xlane.xlu0 %128 }
 0x132   :  { %437 = vlog2.f32 %v129_v26 }
 0x135   :  { %v132_v27 = vpop.xlane.xlu1 %131  ;;  %v233_v28 = vpop.xlane.xlu0 %232 }
 0x136   :  { %439 = vlog2.f32 %v132_v27 }
 0x137   :  { %441 = vrcp.f32 %v233_v28 }
 0x138   :  { %443 = vlog2.f32 %v233_v28 }
 0x139   :  { %v236_v29 = vpop.xlane.xlu1 %235  ;;  %v135_v30 = vpop.xlane.xlu0 %134 }
 0x13a   :  { %445 = vrcp.f32 %v236_v29 }
 0x13b   :  { %447 = vlog2.f32 %v236_v29 }
 0x13c   :  { %449 = vlog2.f32 %v135_v30  ;;  %v438_v41 = vpop.eup %437 }
 0x13d   :  { %v239_v31 = vpop.xlane.xlu1 %238  ;;  %v138_v32 = vpop.xlane.xlu0 %137  ;;  %v152_v59 = vmul.f32 0.6931472, %v438_v41 }
 0x13e   :  { %451 = vrcp.f32 %v239_v31 }
 0x13f   :  { %453 = vlog2.f32 %v239_v31 }
 0x140   :  { %455 = vlog2.f32 %v138_v32  ;;  %v440_v38 = vpop.eup %439 }
 0x141   :  { %v242_v33 = vpop.xlane.xlu1 %241  ;;  %v141_v34 = vpop.xlane.xlu0 %140  ;;  %v154_v61 = vmul.f32 0.6931472, %v440_v38 }
 0x142   :  { %457 = vrcp.f32 %v242_v33  ;;  %v442_v42 = vpop.eup %441 }
 0x143   :  { %459 = vlog2.f32 %v242_v33  ;;  %v444_v39 = vpop.eup %443 }
 0x144   :  { %461 = vlog2.f32 %v141_v34  ;;  %v446_v47 = vpop.eup %445  ;;  %v320_v13 = vmul.f32 0.6931472, %v444_v39 }
 0x145   :  { %v245_v35 = vpop.xlane.xlu1 %244  ;;  %v144_v36 = vpop.xlane.xlu0 %143 }
 0x146   :  { %463 = vrcp.f32 %v245_v35  ;;  %v448_v48 = vpop.eup %447 }
 0x147   :  { %465 = vlog2.f32 %v245_v35  ;;  %v450_v49 = vpop.eup %449  ;;  %v322_v50 = vmul.f32 0.6931472, %v448_v48 }
 0x148   :  { %467 = vlog2.f32 %v144_v36  ;;  %v452_v52 = vpop.eup %451  ;;  %v156_v0 = vmul.f32 0.6931472, %v450_v49 }
 0x149   :  { %v248_v37 = vpop.xlane.xlu1 %247  ;;  %v147_v40 = vpop.xlane.xlu0 %146 }
 0x14a   :  { %469 = vrcp.f32 %v248_v37  ;;  %v454_v45 = vpop.eup %453 }
 0x14b   :  { %471 = vlog2.f32 %v248_v37  ;;  %v456_v55 = vpop.eup %455  ;;  %v324_v16 = vmul.f32 0.6931472, %v454_v45 }
 0x14c   :  { %473 = vlog2.f32 %v147_v40  ;;  %v458_v58 = vpop.eup %457  ;;  %v158_v63 = vmul.f32 0.6931472, %v456_v55 }
 0x14d   :  { %v251_v43 = vpop.xlane.xlu1 %250  ;;  %v150_v46 = vpop.xlane.xlu0 %149 }
 0x14e   :  { %475 = vrcp.f32 %v251_v43  ;;  %v460_v60 = vpop.eup %459 }
 0x14f   :  { %477 = vlog2.f32 %v251_v43  ;;  %v462_v3 = vpop.eup %461  ;;  %v326_v20 = vmul.f32 0.6931472, %v460_v60 }
 0x150   :  { %479 = vlog2.f32 %v150_v46  ;;  %v464_v9 = vpop.eup %463  ;;  %v160_v5 = vmul.f32 0.6931472, %v462_v3 }
 0x151   :  { %v254_v44 = vpop.xlane.xlu1 %253  ;;  %v273_v53 = vpop.xlane.xlu0 %272 }
 0x152   :  { %v296_v54 = vmul.f32 %v442_v42, %v273_v53  ;;  %481 = vrcp.f32 %v254_v44  ;;  %v466_v10 = vpop.eup %465 }
 0x153   :  { %483 = vlog2.f32 %v254_v44  ;;  %v468_v14 = vpop.eup %467  ;;  %v328_v25 = vmul.f32 0.6931472, %v466_v10 }
 0x154   :  { %v311_v6 = vadd.f32 %v296_v54, %v152_v59  ;;  %v470_v62 = vpop.eup %469  ;;  %v162_v30 = vmul.f32 0.6931472, %v468_v14 }
 0x155   :  { %v276_v1 = vpop.xlane.xlu1 %275  ;;  %v279_v2 = vpop.xlane.xlu0 %278 }
 0x156   :  { %v298_v7 = vmul.f32 %v446_v47, %v276_v1  ;;  %v300_v8 = vmul.f32 %v452_v52, %v279_v2  ;;  %v335_v17 = vsub.f32 %v311_v6, %v320_v13  ;;  %v472_v4 = vpop.eup %471  ;;  %v343_v6 = vld [vmem:[#allocation2] sm:$0x1] }
 0x157   :  { %v474_v12 = vpop.eup %473  ;;  %v330_v40 = vmul.f32 0.6931472, %v472_v4 }
 0x158   :  { %v312_v51 = vadd.f32 %v298_v7, %v154_v61  ;;  %v313_v15 = vadd.f32 %v300_v8, %v156_v0  ;;  %v476_v22 = vpop.eup %475  ;;  %v164_v35 = vmul.f32 0.6931472, %v474_v12 }
 0x159   :  { %v282_v56 = vpop.xlane.xlu1 %281  ;;  %v285_v57 = vpop.xlane.xlu0 %284 }
 0x15a   :  { %v336_v18 = vsub.f32 %v312_v51, %v322_v50  ;;  %v302_v19 = vmul.f32 %v458_v58, %v282_v56  ;;  %v304_v11 = vmul.f32 %v464_v9, %v285_v57  ;;  %v337_v24 = vsub.f32 %v313_v15, %v324_v16  ;;  %v478_v29 = vpop.eup %477 }
 0x15b   :  { %v480_v34 = vpop.eup %479  ;;  %v332_v43 = vmul.f32 0.6931472, %v478_v29 }
 0x15c   :  { %v344_v23 = vadd.f32 %v336_v18, %v335_v17  ;;  %v314_v21 = vadd.f32 %v302_v19, %v158_v63  ;;  %v315_v26 = vadd.f32 %v304_v11, %v160_v5  ;;  %v482_v37 = vpop.eup %481  ;;  %v166_v48 = vmul.f32 0.6931472, %v480_v34 }
 0x15d   :  { %v288_v27 = vpop.xlane.xlu1 %287  ;;  %v291_v28 = vpop.xlane.xlu0 %290 }
 0x15e   :  { %v345_v31 = vadd.f32 %v344_v23, %v337_v24  ;;  %v338_v32 = vsub.f32 %v314_v21, %v326_v20  ;;  %v306_v33 = vmul.f32 %v470_v62, %v288_v27  ;;  %v308_v36 = vmul.f32 %v476_v22, %v291_v28  ;;  %v484_v39 = vpop.eup %483 }
 0x15f   :  { %v339_v38 = vsub.f32 %v315_v26, %v328_v25  ;;  %v334_v53 = vmul.f32 0.6931472, %v484_v39 }
 0x160   :  { %v346_v41 = vadd.f32 %v345_v31, %v338_v32  ;;  %v316_v42 = vadd.f32 %v306_v33, %v162_v30  ;;  %v317_v46 = vadd.f32 %v308_v36, %v164_v35 }
 0x161   :  { %v294_v47 = vpop.xlane.xlu1 %293 }
 0x162   :  { %v347_v49 = vadd.f32 %v346_v41, %v339_v38  ;;  %v340_v52 = vsub.f32 %v316_v42, %v330_v40  ;;  %v310_v44 = vmul.f32 %v482_v37, %v294_v47  ;;  %v341_v54 = vsub.f32 %v317_v46, %v332_v43 }
 0x164   :  { %v348_v45 = vadd.f32 %v347_v49, %v340_v52  ;;  %v318_v55 = vadd.f32 %v310_v44, %v166_v48 }
 0x166   :  { %v349_v58 = vadd.f32 %v348_v45, %v341_v54  ;;  %v342_v59 = vsub.f32 %v318_v55, %v334_v53 }
 0x168   :  { %v350_v60 = vadd.f32 %v349_v58, %v342_v59 }
 0x16a   :  { %v351_v61 = vrot.slane %v350_v60, 4 }
 0x16c   :  { %v352_v0 = vadd.f32 %v351_v61, %v350_v60 }
 0x16e   :  { %v353_v1 = vrot.slane %v352_v0, 2 }
 0x170   :  { %v354_v2 = vadd.f32 %v353_v1, %v352_v0 }
 0x172   :  { %v355_v3 = vrot.slane %v354_v2, 1 }
 0x174   :  { %v356_v7 = vadd.f32 %v355_v3, %v354_v2 }
 0x176   :  { %v357_v8 = vadd.f32 %v356_v7, %v343_v6 }
 0x178   :  { %359 = vst.msk [vmem:[#allocation2] sm:$0x1] %vm60_vm1, %v357_v8 }
 0x17f   :  { %v400_v9 = vld [vmem:[#allocation2] ss:$0 sm:$0xff] }
 0x180   :  { %370 = vperm.xlu0 %404, %v400_v9  }
 0x1ff   :  { %v371_v10 = vpop.permute.xlu0 %370 }
 0x200   :  { %373 = vst [vmem:[#allocation3] sm:$0xff] %v371_v10 }
 0x201   :  { %496 = shalt.err (!%p493_p4)
}
 0x202   :  { %s497_s16 = scalar_lea.hbm %s767_s2, 128 }
 0x203   :  { %p498_p5 = scmp.ne.s32.totalorder %s767_s2, %s497_s16  ;;  %p501_p6 = scmp.lt.u32.totalorder %s497_s16, %s767_s2 }
 0x205   :  { %p503_p7 = pnand %p501_p6, %p498_p5 }
 0x207   :  { %506 = shalt.err (!%p503_p7)
}
 0x208   :  { %383 = dma.vmem_to_hbm [thread:$0]  %s381_s1, 128, %s767_s2, [#allocation4]  }
 0x209   :  { %507 = dma.done.wait [#allocation4], 128  }
 0x20a   :  { %508 = vsyncadd [#allocation4], 4294967168 }
 0x20b   :  { %387 = vsyncpa [#allocation4], 1 }

</bundles_post_ra>
